<compile_context>
chip_gen: v7x
topology: tpu7x:2x2x1
jax: 0.10.0
libtpu: 0.0.40
codegen_flags: <defaults>
</compile_context>

<pallas_src>
import jax
import jax.numpy as jnp
from jax.experimental import pallas as pl
from jax.experimental.pallas import tpu as pltpu


def _bcast_kernel(emb_ref, out_ref):
    # emb_ref : VMEM (1, chunk) -- flat slice of the embedding table.
    # out_ref : VMEM (B, chunk) -- the same columns of every batch row.
    # Pure sublane broadcast; the kernel is HBM-write-bound, so this VPU work
    # is free filler under the writeback DMA.
    out_ref[...] = jnp.broadcast_to(emb_ref[...], out_ref.shape)
    # TODO(synk): training-mode dropout (hidden_dropout_prob) not applied; the
    # module's eval-mode dropout is an identity.


def _vmem_budget():
    """(live-tile byte budget, vmem_limit_bytes) derived from physical VMEM."""
    try:
        cap = int(pltpu.get_tpu_info().vmem_capacity_bytes)
    except Exception:
        cap = 64 * 1024 * 1024  # conservative default: v7x per-TensorCore VMEM
    return int(cap * 0.60), int(cap * 0.75)


def _choose_chunk(N, B, itemsize, budget_bytes):
    """Largest lane-dense flat chunk whose pipelined tiles fit the budget.

    Live VMEM per chunk: double-buffered (1, chunk) input tile plus
    double-buffered (B, chunk) output tile -> chunk * itemsize * (2 + 2B).
    Returns None if no legal chunk fits (caller falls back to XLA broadcast).
    """
    per_elem = itemsize * (2 + 2 * B)
    max_elems = budget_bytes // per_elem
    if max_elems <= 0:
        return None
    if N <= max_elems:
        return N                       # whole table resident; one grid step
    if N % 128 != 0 or max_elems < 128:
        return None                    # cannot tile lane-densely; fall back
    # Largest multiple-of-128 divisor of N that fits the budget.
    m, cap = N // 128, max_elems // 128
    best = 1                           # 128 always divides N here
    i = 1
    while i * i <= m:
        if m % i == 0:
            if best < i <= cap:
                best = i
            j = m // i
            if best < j <= cap:
                best = j
        i += 1
    return best * 128


def prefix_encoder_forward(batch_size, embedding_table, *, n_layer, n_head,
                           n_embd, tune_flag=False,
                           min_pallas_bytes=4 * 1024 * 1024):
    """PrefixEncoder.forward(batch_size, tune_flag), eval-mode semantics.

    embedding_table: (pre_seq_len, 2*n_layer*hidden) -- the nn.Embedding weight.
    Returns (B, S, D) if not tune_flag, else (n_layer, 2, B, n_head, S, n_embd).
    """
    S, D = embedding_table.shape
    dtype = embedding_table.dtype
    itemsize = jnp.dtype(dtype).itemsize
    N = S * D

    chunk = None
    if batch_size * N * itemsize >= min_pallas_bytes:
        budget, vmem_limit = _vmem_budget()
        chunk = _choose_chunk(N, batch_size, itemsize, budget)

    if chunk is not None:
        flat_table = embedding_table.reshape(1, N)     # free (contiguous view)
        out = pl.pallas_call(
            _bcast_kernel,
            out_shape=jax.ShapeDtypeStruct((batch_size, N), dtype),
            grid_spec=pltpu.PrefetchScalarGridSpec(
                num_scalar_prefetch=0,
                grid=(N // chunk,),
                in_specs=[pl.BlockSpec((1, chunk), lambda c: (0, c))],
                out_specs=pl.BlockSpec((batch_size, chunk), lambda c: (0, c)),
            ),
            compiler_params=pltpu.CompilerParams(
                dimension_semantics=("parallel",),
                vmem_limit_bytes=vmem_limit),
        )(flat_table)
        out = out.reshape(batch_size, S, D)
    else:
        # Tiny problem (or no legal tiling): fixed pallas_call + per-step
        # overhead exceeds the copy cost, XLA's broadcast is strictly faster.
        out = jnp.broadcast_to(embedding_table[None], (batch_size, S, D))

    if tune_flag:
        # view(B, S, L, 2, n_head, n_embd).permute([2, 3, 0, 4, 1, 5])
        # TODO(synk): this permute could be fused into the out_spec with
        # per-(layer, kv, head) blocks, but the stores are only lane-dense when
        # n_head*n_embd is a multiple of 128; left to XLA glue here.
        out = out.reshape(batch_size, S, n_layer, 2, n_head, n_embd)
        out = jnp.transpose(out, (2, 3, 0, 4, 1, 5))
    return out


if __name__ == "__main__":
    # Small config consistent with the module:
    #   hidden_size=32, num_hidden_layers=2, num_attention_heads=4
    #   -> n_embd = 32 // 4 = 8, embedding dim D = 2 * 2 * 32 = 128
    batch_size = 2
    pre_seq_len = 8
    hidden_size = 32
    n_layer = 2
    n_head = 4
    n_embd = hidden_size // n_head
    D = n_layer * 2 * hidden_size  # 128

    key = jax.random.PRNGKey(0)
    # Deterministic "nn.Embedding" weight (synthetic, not a checkpoint).
    embedding_table = jax.random.normal(key, (pre_seq_len, D), dtype=jnp.float32)

    # Reference: prefix_tokens = arange(S).unsqueeze(0).expand(B, -1); table[tokens]
    prefix_tokens = jnp.broadcast_to(
        jnp.arange(pre_seq_len, dtype=jnp.int32), (batch_size, pre_seq_len))
    ref = embedding_table[prefix_tokens]

    # tune_flag=False path (force the Pallas kernel even at this tiny size).
    out = prefix_encoder_forward(batch_size, embedding_table,
                                 n_layer=n_layer, n_head=n_head, n_embd=n_embd,
                                 tune_flag=False, min_pallas_bytes=0)
    out = jax.block_until_ready(out)
    assert out.shape == (batch_size, pre_seq_len, D), out.shape
    assert jnp.allclose(out, ref), "mismatch vs reference gather"

    # tune_flag=True path: (L, 2, B, n_head, S, n_embd)
    out_t = prefix_encoder_forward(batch_size, embedding_table,
                                   n_layer=n_layer, n_head=n_head, n_embd=n_embd,
                                   tune_flag=True, min_pallas_bytes=0)
    out_t = jax.block_until_ready(out_t)
    assert out_t.shape == (n_layer, 2, batch_size, n_head, pre_seq_len, n_embd), out_t.shape
    ref_t = jnp.transpose(
        ref.reshape(batch_size, pre_seq_len, n_layer, 2, n_head, n_embd),
        (2, 3, 0, 4, 1, 5))
    assert jnp.allclose(out_t, ref_t), "mismatch vs reference permute"

    # Small-size fallback path (pure XLA broadcast) must agree too.
    out_fb = prefix_encoder_forward(batch_size, embedding_table,
                                    n_layer=n_layer, n_head=n_head, n_embd=n_embd,
                                    tune_flag=False)
    out_fb = jax.block_until_ready(out_fb)
    assert jnp.allclose(out_fb, ref), "mismatch in small-size fallback"

    print("KERNEL_OK")
</pallas_src>

<mosaic_0001>
module attributes {stable_mosaic.version = 11 : i64} {
  func.func @_bcast_kernel(%arg0: i32, %arg1: memref<1x1024xf32, #tpu.memory_space<vmem>>, %arg2: memref<2x1024xf32, #tpu.memory_space<vmem>>) attributes {dimension_semantics = [#tpu.dimension_semantics<parallel>], iteration_bounds = array<i64: 1>, scalar_prefetch = 0 : i64, scratch_operands = 0 : i64, tpu.core_type = #tpu.core_type<tc>, window_params = [{transform_indices = @transform_0, window_bounds = array<i64: 1, 1024>}, {transform_indices = @transform_1, window_bounds = array<i64: 2, 1024>}]} {
    %c0 = arith.constant 0 : index
    %c0_0 = arith.constant 0 : index
    %0 = vector.load %arg1[%c0, %c0_0] : memref<1x1024xf32, #tpu.memory_space<vmem>>, vector<1x1024xf32>
    %1 = vector.shape_cast %0 : vector<1x1024xf32> to vector<1x1024xf32>
    %2 = vector.broadcast %1 : vector<1x1024xf32> to vector<2x1024xf32>
    %c0_1 = arith.constant 0 : index
    %c0_2 = arith.constant 0 : index
    %3 = vector.load %arg2[%c0_1, %c0_2] : memref<2x1024xf32, #tpu.memory_space<vmem>>, vector<2x1024xf32>
    tpu.vector_store %arg2[%c0_1, %c0_2], %2 {strides = array<i32>} : memref<2x1024xf32, #tpu.memory_space<vmem>>, vector<2x1024xf32>,
    return
  }
  func.func @transform_0(%arg0: i32) -> (i32, i32) {
    %c0_i32 = arith.constant 0 : i32
    %c0_i32_0 = arith.constant 0 : i32
    return %c0_i32, %arg0 : i32, i32
  }
  func.func @transform_1(%arg0: i32) -> (i32, i32) {
    %c0_i32 = arith.constant 0 : i32
    %c0_i32_0 = arith.constant 0 : i32
    return %c0_i32, %arg0 : i32, i32
  }
}

</mosaic_0001>

<bundles_post_ra>
// kernel: tpu_custom_call.1
= control target key start
LH: loop header
LB: loop body
LE: loop exit
PB: predicated region body
PF: predicated region fallthrough
CT: control target
= control target key end

     0   :  { %6 = vsyncpa [#allocation3], 0  ;;  %s196_s0 = inlined_call_operand.hbm [shape: f32[1,1024], index: 0, kind: input, shape index: {}]   ;;  %s197_s1 = inlined_call_operand.hbm [shape: f32[2,1024], index: 1, kind: output, shape index: {}]  }
   0x1   :  { %7 = vsyncpa [#allocation4], 0  ;;  %s159_s6 = smov [#allocation2]   ;;  %s111_s10 = scalar_lea.hbm %s196_s0, 128 }
   0x2   :  { %s14_s7 = sshll.u32 %s159_s6, 4  ;;  %p112_p0 = scmp.ne.s32.totalorder %s196_s0, %s111_s10  ;;  %s15_s7 = int_to_ptr.vmem [resolvable:$true] %s14_s7 }
   0x3   :  { %p115_p1 = scmp.lt.u32.totalorder %s111_s10, %s196_s0 }
   0x5   :  { %p117_p2 = pnand %p115_p1, %p112_p0 }
   0x7   :  { %120 = shalt.err (!%p117_p2)
}
   0x8   :  { %s121_s15 = scalar_lea.vmem %s15_s7, 128  ;;  %p126_p4 = scmp.lt.s32.totalorder %s15_s7, %s15_s7 }
   0x9   :  { %p122_p3 = scmp.ne.s32.totalorder %s15_s7, %s121_s15  ;;  %p127_p5 = scmp.lt.s32.totalorder %s121_s15, %s121_s15 }
   0xb   :  { %p128_p6 = por %p127_p5, %p126_p4 }
   0xd   :  { %p129_p7 = pnand %p128_p6, %p122_p3 }
   0xf   :  { %132 = shalt.err (!%p129_p7)
}
  0x10   :  { %17 = dma.hbm_to_vmem [thread:$0]  %s196_s0, 128, %s15_s7, [#allocation3]  }
  0x11   :  { %155 = dma.done.wait [#allocation3], 128  }
  0x12   :  { %156 = vsyncadd [#allocation3], 4294967168  ;;  %v23_v0 = vlaneseq  ;;  %v160_v1 = vmov 1983009808   ;;  %v21_v13 = vld [vmem:[#allocation2] sm:$0xff]  ;;  %s161_s0 = smov [#allocation5]  }
  0x13   :  { %v58_v2 = vunpack.c.l.s4 %v160_v1  ;;  %s99_s18 = sshll.u32 %s161_s0, 4  ;;  %s100_s18 = int_to_ptr.vmem [resolvable:$true] %s99_s18 }
  0x14   :  { %v24_v3 = vshrl.u32 %v23_v0, 7  ;;  %s133_s19 = scalar_lea.vmem %s100_s18, 256  ;;  %p138_p9 = scmp.lt.s32.totalorder %s100_s18, %s100_s18 }
  0x15   :  { %v59_v4 = vunpack.c.0.s8 %v58_v2  ;;  %p134_p8 = scmp.ne.s32.totalorder %s100_s18, %s133_s19  ;;  %p139_p10 = scmp.lt.s32.totalorder %s133_s19, %s133_s19 }
  0x16   :  { %v25_v5 = vsub.s32 0, %v24_v3  ;;  %v29_v6 = vsub.s32 1, %v24_v3  ;;  %v33_v7 = vsub.s32 2, %v24_v3  ;;  %v37_v8 = vsub.s32 3, %v24_v3 }
  0x17   :  { %v41_v9 = vsub.s32 4, %v24_v3  ;;  %v45_v10 = vsub.s32 5, %v24_v3  ;;  %v49_v11 = vsub.s32 6, %v24_v3  ;;  %v53_v12 = vsub.s32 7, %v24_v3  ;;  %p140_p11 = por %p139_p10, %p138_p9 }
  0x18   :  { %v62_v14 = vsub.s32 %v59_v4, %v24_v3  ;;  %v26_v15 = vrot.slane %v21_v13, %v25_v5  ;;  %v30_v16 = vrot.slane %v21_v13, %v29_v6  ;;  %v34_v17 = vrot.slane %v21_v13, %v33_v7 }
  0x19   :  { %v38_v18 = vrot.slane %v21_v13, %v37_v8  ;;  %v42_v19 = vrot.slane %v21_v13, %v41_v9  ;;  %v46_v20 = vrot.slane %v21_v13, %v45_v10  ;;  %v50_v21 = vrot.slane %v21_v13, %v49_v11  ;;  %p141_p12 = pnand %p140_p11, %p134_p8 }
  0x1a   :  { %v54_v22 = vrot.slane %v21_v13, %v53_v12  ;;  %v55_v23 = vcombine.low %v26_v15, %v30_v16 }
  0x1b   :  { %v56_v24 = vcombine.low %v34_v17, %v38_v18  ;;  %v72_v25 = vcombine.low %v42_v19, %v46_v20 }
  0x1c   :  { %v73_v26 = vcombine.low %v50_v21, %v54_v22  ;;  %v63_v27 = vrot.slane %v55_v23, %v62_v14 }
  0x1d   :  { %v70_v28 = vrot.slane %v56_v24, %v62_v14  ;;  %v80_v29 = vrot.slane %v72_v25, %v62_v14 }
  0x1e   :  { %v87_v30 = vrot.slane %v73_v26, %v62_v14 }
  0x1f   :  { %v71_v31 = vcombine.low %v63_v27, %v70_v28 }
  0x20   :  { %v88_v32 = vcombine.low %v80_v29, %v87_v30 }
  0x21   :  { %91 = vst [vmem:[#allocation5] sm:$0xff] %v71_v31 }
  0x22   :  { %92 = vst [vmem:[#allocation5 + $0x8] sm:$0xff] %v88_v32 }
  0x23   :  { %144 = shalt.err (!%p141_p12)
}
  0x24   :  { %s145_s22 = scalar_lea.hbm %s197_s1, 256 }
  0x25   :  { %p146_p13 = scmp.ne.s32.totalorder %s197_s1, %s145_s22  ;;  %p149_p0 = scmp.lt.u32.totalorder %s145_s22, %s197_s1 }
  0x27   :  { %p151_p1 = pnand %p149_p0, %p146_p13 }
  0x29   :  { %154 = shalt.err (!%p151_p1)
}
  0x2a   :  { %102 = dma.vmem_to_hbm [thread:$0]  %s100_s18, 256, %s197_s1, [#allocation4]  }
  0x2b   :  { %157 = dma.done.wait [#allocation4], 256  }
  0x2c   :  { %158 = vsyncadd [#allocation4], 4294967040 }
  0x2d   :  { %106 = vsyncpa [#allocation3], 1 }
  0x2e   :  { %107 = vsyncpa [#allocation4], 1 }

</bundles_post_ra>
